<compile_context>
chip_gen: v6e
topology: v6e:2x2x1
jax: 0.10.0
libtpu: 0.0.40
codegen_flags: <defaults>
</compile_context>

<pallas_src>
import jax
import jax.numpy as jnp
from jax.experimental import pallas as pl
from jax.experimental.pallas import tpu as pltpu


def sentence_classifier_kernel(w_ref, b_ref, x_ref, o_ref):
    # w_ref: (2, 2) f32 in SMEM, PyTorch (out, in) layout; b_ref: (2,) f32 in SMEM.
    # x_ref / o_ref: (TR, 256) f32 in VMEM.  Lane 2k   holds feature 0 of a sample,
    #                                        lane 2k+1 holds feature 1 of the same sample.
    x = x_ref[...]
    rows, lanes = x.shape

    lane = jax.lax.broadcasted_iota(jnp.int32, (rows, lanes), dimension=1)
    is_even = (lane & 1) == 0          # True on feature-0 / class-0 lanes

    w00 = w_ref[0, 0]
    w01 = w_ref[0, 1]
    w10 = w_ref[1, 0]
    w11 = w_ref[1, 1]
    b0 = b_ref[0]
    b1 = b_ref[1]

    # Partner feature of every lane (adjacent even/odd pair swap).
    # np.roll semantics: roll(x, lanes-1) == shift -1 -> lane i takes lane i+1;
    # roll(x, 1) -> lane i takes lane i-1.  The wrap-around lanes land only on
    # lanes where the other branch of the select is used, so no sample mixing.
    x_pair = jnp.where(is_even,
                       pltpu.roll(x, lanes - 1, axis=1),   # even lane: partner at +1
                       pltpu.roll(x, 1, axis=1))           # odd  lane: partner at -1

    # Lane-patterned parameter vregs (a handful of selects per 256K-element tile).
    w_ss = jnp.where(is_even, w00, w11)   # own class  * own feature
    w_sp = jnp.where(is_even, w01, w10)   # own class  * partner feature
    b_s = jnp.where(is_even, b0, b1)
    w_os = jnp.where(is_even, w10, w01)   # other class * own feature
    w_op = jnp.where(is_even, w11, w00)   # other class * partner feature
    b_o = jnp.where(is_even, b1, b0)

    # Linear(2, 2): pure VPU FMAs.
    y_s = w_ss * x + w_sp * x_pair + b_s      # logit of this lane's own class
    y_o = w_os * x + w_op * x_pair + b_o      # logit of the other class

    # LeakyReLU(negative_slope=0.01) as a single max per logit.
    y_s = jnp.maximum(y_s, 0.01 * y_s)
    y_o = jnp.maximum(y_o, 0.01 * y_o)

    # 2-class softmax: out_self = sigmoid(y_self - y_other).
    # exp on the EUP; exact reciprocal so results match the reference tightly.
    t = 1.0 + jnp.exp(y_o - y_s)
    o_ref[...] = pl.reciprocal(t, approx=False)


def _pick_tile_rows(n_rows, max_tile_rows):
    """Rows per block: multiple of 8 (or the full extent), >=2 grid steps when possible."""
    if n_rows <= 8:
        return n_rows                               # single block == full extent
    if n_rows <= max_tile_rows:
        half = ((pl.cdiv(n_rows, 2) + 7) // 8) * 8  # split so both TCs get work (v7x)
        return min(max_tile_rows, max(8, half))
    return max_tile_rows


def sentence_level_classifier(in_att, weight, bias, *, max_tile_rows=2048):
    """in_att: (N, 2) f32, weight: (2, 2) f32 (out, in), bias: (2,) f32 -> (N, 2) f32."""
    n, f_in = in_att.shape
    f_out = weight.shape[0]
    assert f_in == 2 and f_out == 2

    lanes = 256                      # 128 samples * 2 interleaved features per row
    n_pad = pl.cdiv(n, 128) * 128    # pad only to the 128-sample row, not to tile size
    x = in_att
    if n_pad != n:
        x = jnp.pad(x, ((0, n_pad - n), (0, 0)))
    n_rows = n_pad // 128
    x2 = x.reshape(n_rows, lanes)    # free view: row-major bytes are unchanged

    tile_rows = _pick_tile_rows(n_rows, max_tile_rows)
    grid = (pl.cdiv(n_rows, tile_rows),)   # partial edge block is masked on writeback

    out2 = pl.pallas_call(
        sentence_classifier_kernel,
        out_shape=jax.ShapeDtypeStruct((n_rows, lanes), jnp.float32),
        grid=grid,
        in_specs=[
            pl.BlockSpec(memory_space=pltpu.MemorySpace.SMEM),   # weight (2, 2)
            pl.BlockSpec(memory_space=pltpu.MemorySpace.SMEM),   # bias (2,)
            pl.BlockSpec((tile_rows, lanes), lambda i: (i, 0)),  # x tile
        ],
        out_specs=pl.BlockSpec((tile_rows, lanes), lambda i: (i, 0)),
        compiler_params=pltpu.CompilerParams(
            dimension_semantics=("parallel",)),
    )(weight, bias, x2)

    out = out2.reshape(n_pad, f_out)   # free view back to (N_pad, 2)
    if n_pad != n:
        out = out[:n]
    return out


def reference(in_att, weight, bias):
    y = in_att @ weight.T + bias
    y = jnp.where(y >= 0.0, y, 0.01 * y)
    return jax.nn.softmax(y, axis=1)


if __name__ == "__main__":
    key = jax.random.PRNGKey(0)
    k_x, k_w, k_b = jax.random.split(key, 3)

    # Small shapes consistent with the module: a batch of 8 "sentences",
    # each with a 2-dim attention summary vector.
    N, F_IN, F_OUT = 8, 2, 2
    in_att = jax.random.normal(k_x, (N, F_IN), dtype=jnp.float32)

    # Deterministic parameter init (mimics nn.Linear's uniform(-1/sqrt(in), 1/sqrt(in))).
    bound = 1.0 / jnp.sqrt(jnp.float32(F_IN))
    weight = jax.random.uniform(k_w, (F_OUT, F_IN), jnp.float32, -bound, bound)
    bias = jax.random.uniform(k_b, (F_OUT,), jnp.float32, -bound, bound)

    out = sentence_level_classifier(in_att, weight, bias)
    out = jax.block_until_ready(out)

    ref = reference(in_att, weight, bias)
    assert out.shape == (N, F_OUT)
    assert jnp.allclose(out, ref, atol=1e-5, rtol=1e-5), "mismatch vs reference"
    assert jnp.allclose(jnp.sum(out, axis=1), 1.0, atol=1e-5)   # softmax rows sum to 1

    # Secondary check exercising multi-row blocks + tail handling (N not a 128 multiple).
    in_att2 = jax.random.normal(jax.random.PRNGKey(1), (300, F_IN), dtype=jnp.float32)
    out2 = jax.block_until_ready(sentence_level_classifier(in_att2, weight, bias))
    assert jnp.allclose(out2, reference(in_att2, weight, bias), atol=1e-5, rtol=1e-5)

    print("KERNEL_OK")
</pallas_src>

<mosaic_0001>
module attributes {stable_mosaic.version = 11 : i64} {
  func.func @sentence_classifier_kernel(%arg0: i32, %arg1: memref<2x2xf32, #tpu.memory_space<smem>>, %arg2: memref<2xf32, #tpu.memory_space<smem>>, %arg3: memref<1x256xf32, #tpu.memory_space<vmem>>, %arg4: memref<1x256xf32, #tpu.memory_space<vmem>>) attributes {dimension_semantics = [#tpu.dimension_semantics<parallel>], iteration_bounds = array<i64: 1>, scalar_prefetch = 0 : i64, scratch_operands = 0 : i64, tpu.core_type = #tpu.core_type<tc>, window_params = [{transform_indices = @transform_0, window_bounds = array<i64: 2, 2>}, {transform_indices = @transform_1, window_bounds = array<i64: 2>}, {transform_indices = @transform_2, window_bounds = array<i64: 1, 256>}, {transform_indices = @transform_3, window_bounds = array<i64: 1, 256>}]} {
    %c0 = arith.constant 0 : index
    %c0_0 = arith.constant 0 : index
    %0 = vector.load %arg3[%c0, %c0_0] : memref<1x256xf32, #tpu.memory_space<vmem>>, vector<1x256xf32>
    %1 = tpu.iota {dimensions = array<i32: 1>} : vector<1x256xi32>
    %c1_i32 = arith.constant 1 : i32
    %2 = vector.broadcast %c1_i32 : i32 to vector<1x256xi32>
    %3 = arith.andi %1, %2 : vector<1x256xi32>
    %c0_i32 = arith.constant 0 : i32
    %4 = vector.broadcast %c0_i32 : i32 to vector<1x256xi32>
    %5 = arith.cmpi eq, %3, %4 : vector<1x256xi32>
    %c0_1 = arith.constant 0 : index
    %c0_2 = arith.constant 0 : index
    %6 = memref.load %arg1[%c0_1, %c0_2] : memref<2x2xf32, #tpu.memory_space<smem>>
    %c0_3 = arith.constant 0 : index
    %c1 = arith.constant 1 : index
    %7 = memref.load %arg1[%c0_3, %c1] : memref<2x2xf32, #tpu.memory_space<smem>>
    %c1_4 = arith.constant 1 : index
    %c0_5 = arith.constant 0 : index
    %8 = memref.load %arg1[%c1_4, %c0_5] : memref<2x2xf32, #tpu.memory_space<smem>>
    %c1_6 = arith.constant 1 : index
    %c1_7 = arith.constant 1 : index
    %9 = memref.load %arg1[%c1_6, %c1_7] : memref<2x2xf32, #tpu.memory_space<smem>>
    %c0_8 = arith.constant 0 : index
    %10 = memref.load %arg2[%c0_8] : memref<2xf32, #tpu.memory_space<smem>>
    %c1_9 = arith.constant 1 : index
    %11 = memref.load %arg2[%c1_9] : memref<2xf32, #tpu.memory_space<smem>>
    %c255_i32 = arith.constant 255 : i32
    %12 = tpu.dynamic_rotate %0 by %c255_i32 dim 1 : vector<1x256xf32>, i32 -> vector<1x256xf32>
    %c1_i32_10 = arith.constant 1 : i32
    %13 = tpu.dynamic_rotate %0 by %c1_i32_10 dim 1 : vector<1x256xf32>, i32 -> vector<1x256xf32>
    %14 = arith.select %5, %12, %13 : vector<1x256xi1>, vector<1x256xf32>
    %15 = vector.broadcast %6 : f32 to vector<1x256xf32>
    %16 = vector.broadcast %9 : f32 to vector<1x256xf32>
    %17 = arith.select %5, %15, %16 : vector<1x256xi1>, vector<1x256xf32>
    %18 = vector.broadcast %7 : f32 to vector<1x256xf32>
    %19 = vector.broadcast %8 : f32 to vector<1x256xf32>
    %20 = arith.select %5, %18, %19 : vector<1x256xi1>, vector<1x256xf32>
    %21 = vector.broadcast %10 : f32 to vector<1x256xf32>
    %22 = vector.broadcast %11 : f32 to vector<1x256xf32>
    %23 = arith.select %5, %21, %22 : vector<1x256xi1>, vector<1x256xf32>
    %24 = vector.broadcast %8 : f32 to vector<1x256xf32>
    %25 = vector.broadcast %7 : f32 to vector<1x256xf32>
    %26 = arith.select %5, %24, %25 : vector<1x256xi1>, vector<1x256xf32>
    %27 = vector.broadcast %9 : f32 to vector<1x256xf32>
    %28 = vector.broadcast %6 : f32 to vector<1x256xf32>
    %29 = arith.select %5, %27, %28 : vector<1x256xi1>, vector<1x256xf32>
    %30 = vector.broadcast %11 : f32 to vector<1x256xf32>
    %31 = vector.broadcast %10 : f32 to vector<1x256xf32>
    %32 = arith.select %5, %30, %31 : vector<1x256xi1>, vector<1x256xf32>
    %33 = arith.mulf %17, %0 : vector<1x256xf32>
    %34 = arith.mulf %20, %14 : vector<1x256xf32>
    %35 = arith.addf %33, %34 : vector<1x256xf32>
    %36 = arith.addf %35, %23 : vector<1x256xf32>
    %37 = arith.mulf %26, %0 : vector<1x256xf32>
    %38 = arith.mulf %29, %14 : vector<1x256xf32>
    %39 = arith.addf %37, %38 : vector<1x256xf32>
    %40 = arith.addf %39, %32 : vector<1x256xf32>
    %cst = arith.constant 0.00999999977 : f32
    %41 = vector.broadcast %cst : f32 to vector<1x256xf32>
    %42 = arith.mulf %41, %36 : vector<1x256xf32>
    %43 = arith.maximumf %36, %42 : vector<1x256xf32>
    %cst_11 = arith.constant 0.00999999977 : f32
    %44 = vector.broadcast %cst_11 : f32 to vector<1x256xf32>
    %45 = arith.mulf %44, %40 : vector<1x256xf32>
    %46 = arith.maximumf %40, %45 : vector<1x256xf32>
    %47 = arith.subf %46, %43 : vector<1x256xf32>
    %48 = math.exp %47 : vector<1x256xf32>
    %cst_12 = arith.constant 1.000000e+00 : f32
    %49 = vector.broadcast %cst_12 : f32 to vector<1x256xf32>
    %50 = arith.addf %49, %48 : vector<1x256xf32>
    %51 = tpu.reciprocal %50 : vector<1x256xf32> -> vector<1x256xf32>
    %c0_13 = arith.constant 0 : index
    %c0_14 = arith.constant 0 : index
    %52 = vector.load %arg4[%c0_13, %c0_14] : memref<1x256xf32, #tpu.memory_space<vmem>>, vector<1x256xf32>
    tpu.vector_store %arg4[%c0_13, %c0_14], %51 {strides = array<i32>} : memref<1x256xf32, #tpu.memory_space<vmem>>, vector<1x256xf32>,
    return
  }
  func.func @transform_0(%arg0: i32) -> (i32, i32) {
    %c0_i32 = arith.constant 0 : i32
    %c0_i32_0 = arith.constant 0 : i32
    %c0_i32_1 = arith.constant 0 : i32
    return %c0_i32, %c0_i32_0 : i32, i32
  }
  func.func @transform_1(%arg0: i32) -> i32 {
    %c0_i32 = arith.constant 0 : i32
    %c0_i32_0 = arith.constant 0 : i32
    return %c0_i32 : i32
  }
  func.func @transform_2(%arg0: i32) -> (i32, i32) {
    %c0_i32 = arith.constant 0 : i32
    %c0_i32_0 = arith.constant 0 : i32
    return %arg0, %c0_i32 : i32, i32
  }
  func.func @transform_3(%arg0: i32) -> (i32, i32) {
    %c0_i32 = arith.constant 0 : i32
    %c0_i32_0 = arith.constant 0 : i32
    return %arg0, %c0_i32 : i32, i32
  }
}

</mosaic_0001>

<bundles_post_ra>
// kernel: tpu_custom_call.1
= control target key start
LH: loop header
LB: loop body
LE: loop exit
PB: predicated region body
PF: predicated region fallthrough
CT: control target
= control target key end

     0   :  { %8 = vsyncpa [#allocation4], 0  ;;  %s316_s0 = inlined_call_operand.hbm [shape: f32[2,2], index: 0, kind: input, shape index: {}]   ;;  %s317_s1 = inlined_call_operand.vmem [shape: f32[2], index: 1, kind: input, shape index: {}]   ;;  %s318_s2 = inlined_call_operand.vmem [shape: f32[1,256], index: 2, kind: input, shape index: {}]   ;;  %s319_s3 = inlined_call_operand.hbm [shape: f32[1,256], index: 3, kind: output, shape index: {}]  }
   0x1   :  { %9 = vsyncpa [#allocation5], 0 }
   0x2   :  { %10 = vsyncpa [#allocation3], 0  ;;  %s25_s14 = sshll.u32 %s317_s1, 4  ;;  %s234_s15 = smov [#allocation2]   ;;  %s26_s14 = int_to_ptr.vmem [resolvable:$true] %s25_s14 }
   0x3   :  { %18 = dma.hbm_to_smem %s316_s0, 32, %s234_s15, [#allocation4]  }
   0x4   :  { %s196_s18 = scalar_lea.vmem %s26_s14, 16  ;;  %p201_p1 = scmp.lt.s32.totalorder %s26_s14, %s26_s14 }
   0x5   :  { %p197_p0 = scmp.ne.s32.totalorder %s26_s14, %s196_s18  ;;  %p202_p2 = scmp.lt.s32.totalorder %s196_s18, %s196_s18 }
   0x7   :  { %p203_p3 = por %p202_p2, %p201_p1 }
   0x9   :  { %p204_p4 = pnand %p203_p3, %p197_p0 }
   0xb   :  { %207 = shalt.err (!%p204_p4)
}
   0xc   :  { %s235_s19 = smov [#allocation6]  }
   0xd   :  { %28 = dma.vmem_to_smem %s26_s14, 16, %s235_s19, [#allocation5]  }
   0xe   :  { %228 = dma.done.wait [#allocation4], 32  }
   0xf   :  { %229 = vsyncadd [#allocation4], 4294967264 }
  0x10   :  { %230 = dma.done.wait [#allocation5], 16  }
  0x11   :  { %231 = vsyncadd [#allocation5], 4294967280 }
  0x12   :  { %37 = sfence }
  0x13   :  { %v39_v0 = vlaneseq  ;;  %s46_s1 = sld [smem:[#allocation2]]  ;;  %v38_v3 = vld [vmem:[%s318_s2] sm:$0x3]  ;;  %s236_s24 = smov 1   ;;  %v238_v11 = vmov 1966171168  }
  0x14   :  { %s170_s0 = sld [smem:[#allocation2 + $0x1]]  ;;  %s237_s25 = smov 127   ;;  %v135_v12 = vunpack.c.l.s4 %v238_v11 }
  0x15   :  { %v267_v1 = vshrl.u32 %v39_v0, 7  ;;  %v40_v2 = vand.u32 127, %v39_v0  ;;  %s171_s22 = sld [smem:[#allocation2 + $0x80]]  ;;  %s239_s27 = smov [#allocation7]   ;;  %vm151_vm4 = vcmp.lt.s32.totalorder %v39_v0, 256 }
  0x16   :  { %s172_s23 = sld [smem:[#allocation2 + $0x81]]  ;;  %s160_s28 = sshll.u32 %s239_s27, 4  ;;  %s161_s28 = int_to_ptr.vmem [resolvable:$true] %s160_s28 }
  0x17   :  { %v55_v4 = vsub.s32 0, %v267_v1  ;;  %v59_v5 = vsub.s32 1, %v267_v1  ;;  %v41_v6 = vadd.s32 128, %v40_v2  ;;  %v42_v7 = vand.u32 1, %v40_v2  ;;  %s50_s2 = sld [smem:[#allocation6]]  ;;  %s208_s29 = scalar_lea.vmem %s161_s28, 32 }
  0x18   :  { %s173_s26 = sld [smem:[#allocation6 + $0x1]]  ;;  %vm74_vm2 = vcmp.lt.s32.totalorder %v40_v2, 1  ;;  %vm67_vm3 = vcmp.lt.s32.totalorder %v40_v2, 127  ;;  %p209_p5 = scmp.ne.s32.totalorder %s161_s28, %s208_s29 }
  0x19   :  { %v56_v8 = vrot.slane %v38_v3, %v55_v4  ;;  %v43_v9 = vand.u32 1, %v41_v6  ;;  %v60_v10 = vrot.slane %v38_v3, %v59_v5  ;;  %vm275_vm0 = vcmp.eq.s32.totalorder %v42_v7, 0  ;;  %p213_p6 = scmp.lt.s32.totalorder %s161_s28, %s161_s28  ;;  %p214_p7 = scmp.lt.s32.totalorder %s208_s29, %s208_s29 }
  0x1a   :  { %v79_v13 = vstv %s46_s1  ;;  %v83_v14 = vstv %s170_s0 }
  0x1b   :  { %70 = vrot.lane.b32.xlu1 %v56_v8, %s236_s24  ;;  %63 = vrot.lane.b32.xlu0 %v56_v8, %s237_s25  ;;  %vm279_vm1 = vcmp.eq.s32.totalorder %v43_v9, 0  ;;  %v84_v15 = vstv %s171_s22  ;;  %p215_p8 = por %p214_p7, %p213_p6 }
  0x1c   :  { %v80_v16 = vstv %s172_s23  ;;  %v91_v19 = vsel %vm275_vm0, %v84_v15, %v83_v14  ;;  %v92_v20 = vsel %vm279_vm1, %v84_v15, %v83_v14  ;;  %v85_v27 = vsel %vm275_vm0, %v83_v14, %v84_v15 }
  0x1d   :  { %v81_v17 = vsel %vm275_vm0, %v79_v13, %v80_v16  ;;  %v82_v18 = vsel %vm279_vm1, %v79_v13, %v80_v16  ;;  %v106_v22 = vmul.f32 %v92_v20, %v60_v10  ;;  %v105_v24 = vmul.f32 %v91_v19, %v56_v8  ;;  %p216_p9 = pnand %p215_p8, %p209_p5 }
  0x1e   :  { %v98_v21 = vmul.f32 %v82_v18, %v60_v10  ;;  %v97_v23 = vmul.f32 %v81_v17, %v56_v8  ;;  %v86_v28 = vsel %vm279_vm1, %v83_v14, %v84_v15  ;;  %v87_v30 = vstv %s50_s2 }
  0x1f   :  { %72 = vrot.lane.b32.xlu1 %v60_v10, %s236_s24  ;;  %65 = vrot.lane.b32.xlu0 %v60_v10, %s237_s25  ;;  %v88_v31 = vstv %s173_s26  ;;  %v93_v32 = vsel %vm275_vm0, %v80_v16, %v79_v13  ;;  %v94_v33 = vsel %vm279_vm1, %v80_v16, %v79_v13  ;;  %v136_v13 = vunpack.c.0.s8 %v135_v12 }
  0x20   :  { %v89_v45 = vsel %vm275_vm0, %v87_v30, %v88_v31  ;;  %v90_v46 = vsel %vm279_vm1, %v87_v30, %v88_v31  ;;  %v95_v47 = vsel %vm275_vm0, %v88_v31, %v87_v30  ;;  %v96_v48 = vsel %vm279_vm1, %v88_v31, %v87_v30 }
  0x21   :  { %v139_v15 = vsub.s32 %v136_v13, %v267_v1 }
  0x8d   :  { %v71_v25 = vpop.permute.xlu1 %70  ;;  %v64_v26 = vpop.permute.xlu0 %63 }
  0x91   :  { %v73_v29 = vpop.permute.xlu1 %72  ;;  %v66_v34 = vpop.permute.xlu0 %65 }
  0x92   :  { %v75_v35 = vsel %vm74_vm2, %v71_v25, %v73_v29  ;;  %v76_v36 = vsel %vm74_vm2, %v73_v29, %v71_v25  ;;  %v68_v37 = vsel %vm67_vm3, %v64_v26, %v66_v34  ;;  %v69_v38 = vsel %vm67_vm3, %v66_v34, %v64_v26 }
  0x93   :  { %v77_v39 = vsel %vm275_vm0, %v68_v37, %v76_v36  ;;  %v78_v40 = vsel %vm279_vm1, %v69_v38, %v75_v35 }
  0x94   :  { %v99_v41 = vmul.f32 %v85_v27, %v77_v39  ;;  %v100_v42 = vmul.f32 %v86_v28, %v78_v40  ;;  %v107_v43 = vmul.f32 %v93_v32, %v77_v39  ;;  %v108_v44 = vmul.f32 %v94_v33, %v78_v40 }
  0x96   :  { %v101_v49 = vadd.f32 %v99_v41, %v97_v23  ;;  %v102_v50 = vadd.f32 %v100_v42, %v98_v21  ;;  %v109_v51 = vadd.f32 %v107_v43, %v105_v24  ;;  %v110_v52 = vadd.f32 %v108_v44, %v106_v22 }
  0x98   :  { %v103_v53 = vadd.f32 %v101_v49, %v89_v45  ;;  %v104_v54 = vadd.f32 %v102_v50, %v90_v46  ;;  %v111_v55 = vadd.f32 %v109_v51, %v95_v47  ;;  %v112_v56 = vadd.f32 %v110_v52, %v96_v48 }
  0x9a   :  { %v113_v57 = vmul.f32 0.01, %v103_v53  ;;  %v114_v58 = vmul.f32 0.01, %v104_v54  ;;  %v117_v59 = vmul.f32 0.01, %v111_v55 }
  0x9b   :  { %v118_v60 = vmul.f32 0.01, %v112_v56 }
  0x9c   :  { %v115_v61 = vmax.f32 %v103_v53, %v113_v57  ;;  %v116_v62 = vmax.f32 %v104_v54, %v114_v58  ;;  %v119_v63 = vmax.f32 %v111_v55, %v117_v59 }
  0x9d   :  { %v120_v2 = vmax.f32 %v112_v56, %v118_v60 }
  0x9e   :  { %v121_v3 = vsub.f32 %v119_v63, %v115_v61 }
  0x9f   :  { %v122_v4 = vsub.f32 %v120_v2, %v116_v62 }
  0xa0   :  { %v123_v5 = vmul.f32 1.442695, %v121_v3 }
  0xa1   :  { %v125_v6 = vmul.f32 1.442695, %v122_v4 }
  0xa2   :  { %180 = vpow2.f32 %v123_v5 }
  0xa3   :  { %182 = vpow2.f32 %v125_v6 }
  0xaf   :  { %v181_v7 = vpop.eup %180 }
  0xb0   :  { %v183_v8 = vpop.eup %182  ;;  %v127_v9 = vadd.f32 1.0, %v181_v7 }
  0xb1   :  { %v128_v10 = vadd.f32 1.0, %v183_v8 }
  0xb2   :  { %184 = vrcp.f32 %v127_v9 }
  0xb3   :  { %186 = vrcp.f32 %v128_v10 }
  0xbf   :  { %v185_v14 = vpop.eup %184 }
  0xc0   :  { %v187_v16 = vpop.eup %186 }
  0xc1   :  { %v133_v17 = vcombine.low %v185_v14, %v187_v16 }
  0xc3   :  { %v140_v18 = vrot.slane %v133_v17, %v139_v15 }
  0xc5   :  { %v147_v19 = vrot.slane %v140_v18, %v139_v15 }
  0xc7   :  { %153 = vst.msk [vmem:[#allocation7] sm:$0x3] %vm151_vm4, %v147_v19 }
  0xc8   :  { %219 = shalt.err (!%p216_p9)
}
  0xc9   :  { %163 = dma.vmem_to_hbm [thread:$0]  %s161_s28, 32, %s319_s3, [#allocation3]  }
  0xca   :  { %232 = dma.done.wait [#allocation3], 32  }
  0xcb   :  { %233 = vsyncadd [#allocation3], 4294967264 }
  0xcc   :  { %167 = vsyncpa [#allocation3], 1 }
  0xcd   :  { %168 = vsyncpa [#allocation4], 1 }
  0xce   :  { %169 = vsyncpa [#allocation5], 1 }

</bundles_post_ra>
